<compile_context>
chip_gen: v5e
topology: v5e:2x2
jax: 0.10.0
libtpu: 0.0.40
codegen_flags: <defaults>
</compile_context>

<pallas_src>
import functools

import jax
import jax.numpy as jnp
import numpy as np
from jax.experimental import pallas as pl
from jax.experimental.pallas import tpu as pltpu


def _scale_upsample_kernel(w_ref, x_ref, o_ref, *, h: int, w: int):
    # w_ref: (C, C)   x_ref: (1, C, H*W)   o_ref: (1, 4*C, H*W)
    hw = h * w
    c = w_ref.shape[0]

    x = x_ref[0]                                                  # (C, H*W)

    # 1x1-conv channel mix for ALL output channels at once (MXU).  Mixing at
    # low resolution first is exact: Conv1x1 and the (linear, per-channel)
    # bilinear upsample act on disjoint axes, so they commute.
    mixed = jnp.dot(w_ref[...], x,
                    preferred_element_type=jnp.float32)           # (C, H*W)

    # ---- bilinear 2x upsample (align_corners=False) on the VPU ------------
    # out[2j]   = 0.25 * x[max(j-1,0)] + 0.75 * x[j]
    # out[2j+1] = 0.75 * x[j]          + 0.25 * x[min(j+1,L-1)]
    #
    # H axis: rows are W-contiguous in the flattened lane dim, so a clamped
    # shift by +-W is a pure concat of lane slices (pltpu.roll would also do).
    up_h = jnp.concatenate([mixed[:, :w], mixed[:, :-w]], axis=1)    # x[h-1]
    dn_h = jnp.concatenate([mixed[:, w:], mixed[:, -w:]], axis=1)    # x[h+1]
    even_h = 0.75 * mixed + 0.25 * up_h                              # row 2h
    odd_h = 0.75 * mixed + 0.25 * dn_h                               # row 2h+1

    # W axis: a shift by +-1 along the flattened lane dim crosses row
    # boundaries, so clamp the w==0 / w==W-1 columns with an iota mask.
    pos = jax.lax.broadcasted_iota(jnp.int32, (c, hw), 1)
    w_idx = pos % w
    first_col = w_idx == 0
    last_col = w_idx == (w - 1)

    def lerp_w(y):
        left = jnp.concatenate([y[:, :1], y[:, :-1]], axis=1)        # y[w-1]
        left = jnp.where(first_col, y, left)
        right = jnp.concatenate([y[:, 1:], y[:, -1:]], axis=1)       # y[w+1]
        right = jnp.where(last_col, y, right)
        return 0.75 * y + 0.25 * left, 0.75 * y + 0.25 * right       # col 2w, 2w+1

    ee, eo = lerp_w(even_h)      # out[2h,   2w], out[2h,   2w+1]
    oe, oo = lerp_w(odd_h)       # out[2h+1, 2w], out[2h+1, 2w+1]

    # One dense (4*C, H*W) = (16, 256) store: full sublane groups, lane dim a
    # multiple of 128 (no masked vst).  Parity-major; wrapper de-interleaves.
    o_ref[0] = jnp.concatenate([ee, eo, oe, oo], axis=0).astype(o_ref.dtype)


@jax.jit
def scale_up_sample(x: jnp.ndarray, weight: jnp.ndarray) -> jnp.ndarray:
    """x: (N, C, H, W) f32, weight: (C_out=C, C_in=C) 1x1-conv weight.
    Returns (N, C, 2H, 2W) == Conv1x1(Upsample2x_bilinear(x))."""
    n, c, h, w = x.shape
    hw = h * w

    # Lane-dense input layout: spatial dims flattened to the lane axis.
    x_flat = x.reshape(n, c, hw)

    kernel = functools.partial(_scale_upsample_kernel, h=h, w=w)

    flops = n * (2 * c * c * hw + 18 * c * hw)
    bytes_accessed = 4 * (n * c * hw + c * c + n * 4 * c * hw)

    grid_spec = pltpu.PrefetchScalarGridSpec(
        num_scalar_prefetch=0,
        grid=(n,),
        in_specs=[
            pl.BlockSpec((c, c), lambda ni: (0, 0)),           # weight, resident
            pl.BlockSpec((1, c, hw), lambda ni: (ni, 0, 0)),   # x[n]
        ],
        out_specs=pl.BlockSpec((1, 4 * c, hw), lambda ni: (ni, 0, 0)),
    )

    out_flat = pl.pallas_call(
        kernel,
        out_shape=jax.ShapeDtypeStruct((n, 4 * c, hw), x.dtype),
        grid_spec=grid_spec,
        compiler_params=pltpu.CompilerParams(
            dimension_semantics=("parallel",),
        ),
        cost_estimate=pl.CostEstimate(
            flops=flops, transcendentals=0, bytes_accessed=bytes_accessed),
    )(weight, x_flat)

    # (N, [ph, pw, C], H*W) -> (N, C, 2H, 2W): pure XLA layout plumbing.
    out = out_flat.reshape(n, 2, 2, c, h, w)            # (n, ph, pw, k, h, w)
    out = out.transpose(0, 3, 4, 1, 5, 2)               # (n, k, h, ph, w, pw)
    return out.reshape(n, c, 2 * h, 2 * w)


# ----------------------------- reference ----------------------------------
def _upsample_matrix(in_size: int, out_size: int) -> jnp.ndarray:
    """Interpolation matrix (out_size, in_size) for 1-D bilinear upsample,
    matching PyTorch nn.Upsample(mode='bilinear', align_corners=False).
    Built with numpy at trace time (static)."""
    i = np.arange(out_size, dtype=np.float64)
    src = np.maximum((i + 0.5) * (in_size / out_size) - 0.5, 0.0)
    i0 = np.clip(np.floor(src).astype(np.int64), 0, in_size - 1)
    i1 = np.minimum(i0 + 1, in_size - 1)
    lam = src - i0
    a = np.zeros((out_size, in_size), np.float32)
    rows = np.arange(out_size)
    a[rows, i0] += (1.0 - lam)
    a[rows, i1] += lam
    return jnp.asarray(a)


def _reference(x, weight):
    """Pure-JAX reference: bilinear 2x upsample then 1x1 conv (no bias),
    in the same order as the PyTorch module."""
    n, c, h, w = x.shape
    a_h = _upsample_matrix(h, 2 * h)
    a_w = _upsample_matrix(w, 2 * w)
    up = jnp.einsum('oh,nchw,pw->ncop', a_h, x, a_w, precision='highest')
    return jnp.einsum('kc,ncop->nkop', weight, up, precision='highest')


if __name__ == "__main__":
    key = jax.random.PRNGKey(0)
    kx, kw = jax.random.split(key)

    N, C, H, W = 2, 4, 16, 16
    x = jax.random.normal(kx, (N, C, H, W), dtype=jnp.float32)
    # Conv2d(C, C, 1, bias=False) weight, kept as (C_out, C_in).
    bound = 1.0 / float(np.sqrt(C))
    weight = jax.random.uniform(kw, (C, C), jnp.float32, -bound, bound)

    out = jax.block_until_ready(scale_up_sample(x, weight))
    ref = _reference(x, weight)

    assert out.shape == (N, C, 2 * H, 2 * W)
    assert jnp.allclose(out, ref, atol=1e-4, rtol=1e-4)
    print("KERNEL_OK")
</pallas_src>

<mosaic_0001>
module attributes {stable_mosaic.version = 11 : i64} {
  func.func @_scale_upsample_kernel(%arg0: i32, %arg1: memref<4x4xf32, #tpu.memory_space<vmem>>, %arg2: memref<1x4x256xf32, #tpu.memory_space<vmem>>, %arg3: memref<1x16x256xf32, #tpu.memory_space<vmem>>) attributes {dimension_semantics = [#tpu.dimension_semantics<parallel>], iteration_bounds = array<i64: 2>, scalar_prefetch = 0 : i64, scratch_operands = 0 : i64, tpu.core_type = #tpu.core_type<tc>, window_params = [{pipeline_mode = #tpu.pipeline_mode<synchronous>, transform_indices = @transform_0, window_bounds = array<i64: 4, 4>}, {transform_indices = @transform_1, window_bounds = array<i64: 1, 4, 256>}, {transform_indices = @transform_2, window_bounds = array<i64: 1, 16, 256>}]} {
    %c0 = arith.constant 0 : index
    %c0_0 = arith.constant 0 : index
    %c0_1 = arith.constant 0 : index
    %0 = vector.load %arg2[%c0, %c0_0, %c0_1] : memref<1x4x256xf32, #tpu.memory_space<vmem>>, vector<1x4x256xf32>
    %1 = vector.shape_cast %0 : vector<1x4x256xf32> to vector<4x256xf32>
    %c0_2 = arith.constant 0 : index
    %c0_3 = arith.constant 0 : index
    %2 = vector.load %arg1[%c0_2, %c0_3] : memref<4x4xf32, #tpu.memory_space<vmem>>, vector<4x4xf32>
    %cst = arith.constant dense<0.000000e+00> : vector<4x256xf32>
    %3 = tpu.matmul %2, %1, %cst {dimension_numbers = #tpu.dot_dimension_numbers<[1], [0], [0], [1], [0, 0, 1, 1], [], []>} : vector<4x4xf32>, vector<4x256xf32>, vector<4x256xf32> -> vector<4x256xf32>
    %4 = vector.extract_strided_slice %3 {offsets = [0, 0], sizes = [4, 16], strides = [1, 1]} : vector<4x256xf32> to vector<4x16xf32>
    %5 = vector.extract_strided_slice %3 {offsets = [0, 0], sizes = [4, 240], strides = [1, 1]} : vector<4x256xf32> to vector<4x240xf32>
    %6 = tpu.concatenate %4, %5 in 1 : vector<4x16xf32>, vector<4x240xf32> -> vector<4x256xf32>
    %7 = vector.extract_strided_slice %3 {offsets = [0, 16], sizes = [4, 240], strides = [1, 1]} : vector<4x256xf32> to vector<4x240xf32>
    %8 = vector.extract_strided_slice %3 {offsets = [0, 240], sizes = [4, 16], strides = [1, 1]} : vector<4x256xf32> to vector<4x16xf32>
    %9 = tpu.concatenate %7, %8 in 1 : vector<4x240xf32>, vector<4x16xf32> -> vector<4x256xf32>
    %cst_4 = arith.constant 7.500000e-01 : f32
    %10 = vector.broadcast %cst_4 : f32 to vector<4x256xf32>
    %11 = arith.mulf %10, %3 : vector<4x256xf32>
    %cst_5 = arith.constant 2.500000e-01 : f32
    %12 = vector.broadcast %cst_5 : f32 to vector<4x256xf32>
    %13 = arith.mulf %12, %6 : vector<4x256xf32>
    %14 = arith.addf %11, %13 : vector<4x256xf32>
    %cst_6 = arith.constant 7.500000e-01 : f32
    %15 = vector.broadcast %cst_6 : f32 to vector<4x256xf32>
    %16 = arith.mulf %15, %3 : vector<4x256xf32>
    %cst_7 = arith.constant 2.500000e-01 : f32
    %17 = vector.broadcast %cst_7 : f32 to vector<4x256xf32>
    %18 = arith.mulf %17, %9 : vector<4x256xf32>
    %19 = arith.addf %16, %18 : vector<4x256xf32>
    %20 = tpu.iota {dimensions = array<i32: 1>} : vector<4x256xi32>
    %c16_i32 = arith.constant 16 : i32
    %c0_i32 = arith.constant 0 : i32
    %21 = arith.cmpi eq, %c16_i32, %c0_i32 : i32
    %c1_i32 = arith.constant 1 : i32
    %22 = arith.select %21, %c1_i32, %c16_i32 : i32
    %23 = vector.broadcast %22 : i32 to vector<4x256xi32>
    %24 = arith.remsi %20, %23 : vector<4x256xi32>
    %c0_i32_8 = arith.constant 0 : i32
    %25 = vector.broadcast %c0_i32_8 : i32 to vector<4x256xi32>
    %26 = arith.cmpi ne, %24, %25 : vector<4x256xi32>
    %c0_i32_9 = arith.constant 0 : i32
    %27 = vector.broadcast %c0_i32_9 : i32 to vector<4x256xi32>
    %28 = arith.cmpi slt, %24, %27 : vector<4x256xi32>
    %c0_i32_10 = arith.constant 0 : i32
    %29 = arith.cmpi slt, %22, %c0_i32_10 : i32
    %30 = vector.broadcast %29 : i1 to vector<4x256xi1>
    %31 = vector.broadcast %30 : vector<4x256xi1> to vector<4x256xi1>
    %32 = arith.xori %28, %31 : vector<4x256xi1>
    %33 = arith.andi %32, %26 : vector<4x256xi1>
    %34 = vector.broadcast %22 : i32 to vector<4x256xi32>
    %35 = arith.addi %24, %34 : vector<4x256xi32>
    %36 = arith.select %33, %35, %24 : vector<4x256xi1>, vector<4x256xi32>
    %c0_i32_11 = arith.constant 0 : i32
    %37 = vector.broadcast %c0_i32_11 : i32 to vector<4x256xi32>
    %38 = arith.cmpi eq, %36, %37 : vector<4x256xi32>
    %c15_i32 = arith.constant 15 : i32
    %39 = vector.broadcast %c15_i32 : i32 to vector<4x256xi32>
    %40 = arith.cmpi eq, %36, %39 : vector<4x256xi32>
    %41 = vector.extract_strided_slice %14 {offsets = [0, 0], sizes = [4, 1], strides = [1, 1]} : vector<4x256xf32> to vector<4x1xf32>
    %42 = vector.extract_strided_slice %14 {offsets = [0, 0], sizes = [4, 255], strides = [1, 1]} : vector<4x256xf32> to vector<4x255xf32>
    %43 = tpu.concatenate %41, %42 in 1 : vector<4x1xf32>, vector<4x255xf32> -> vector<4x256xf32>
    %44 = arith.select %38, %14, %43 : vector<4x256xi1>, vector<4x256xf32>
    %45 = vector.extract_strided_slice %14 {offsets = [0, 1], sizes = [4, 255], strides = [1, 1]} : vector<4x256xf32> to vector<4x255xf32>
    %46 = vector.extract_strided_slice %14 {offsets = [0, 255], sizes = [4, 1], strides = [1, 1]} : vector<4x256xf32> to vector<4x1xf32>
    %47 = tpu.concatenate %45, %46 in 1 : vector<4x255xf32>, vector<4x1xf32> -> vector<4x256xf32>
    %48 = arith.select %40, %14, %47 : vector<4x256xi1>, vector<4x256xf32>
    %cst_12 = arith.constant 7.500000e-01 : f32
    %49 = vector.broadcast %cst_12 : f32 to vector<4x256xf32>
    %50 = arith.mulf %49, %14 : vector<4x256xf32>
    %cst_13 = arith.constant 2.500000e-01 : f32
    %51 = vector.broadcast %cst_13 : f32 to vector<4x256xf32>
    %52 = arith.mulf %51, %44 : vector<4x256xf32>
    %53 = arith.addf %50, %52 : vector<4x256xf32>
    %cst_14 = arith.constant 7.500000e-01 : f32
    %54 = vector.broadcast %cst_14 : f32 to vector<4x256xf32>
    %55 = arith.mulf %54, %14 : vector<4x256xf32>
    %cst_15 = arith.constant 2.500000e-01 : f32
    %56 = vector.broadcast %cst_15 : f32 to vector<4x256xf32>
    %57 = arith.mulf %56, %48 : vector<4x256xf32>
    %58 = arith.addf %55, %57 : vector<4x256xf32>
    %59 = vector.extract_strided_slice %19 {offsets = [0, 0], sizes = [4, 1], strides = [1, 1]} : vector<4x256xf32> to vector<4x1xf32>
    %60 = vector.extract_strided_slice %19 {offsets = [0, 0], sizes = [4, 255], strides = [1, 1]} : vector<4x256xf32> to vector<4x255xf32>
    %61 = tpu.concatenate %59, %60 in 1 : vector<4x1xf32>, vector<4x255xf32> -> vector<4x256xf32>
    %62 = arith.select %38, %19, %61 : vector<4x256xi1>, vector<4x256xf32>
    %63 = vector.extract_strided_slice %19 {offsets = [0, 1], sizes = [4, 255], strides = [1, 1]} : vector<4x256xf32> to vector<4x255xf32>
    %64 = vector.extract_strided_slice %19 {offsets = [0, 255], sizes = [4, 1], strides = [1, 1]} : vector<4x256xf32> to vector<4x1xf32>
    %65 = tpu.concatenate %63, %64 in 1 : vector<4x255xf32>, vector<4x1xf32> -> vector<4x256xf32>
    %66 = arith.select %40, %19, %65 : vector<4x256xi1>, vector<4x256xf32>
    %cst_16 = arith.constant 7.500000e-01 : f32
    %67 = vector.broadcast %cst_16 : f32 to vector<4x256xf32>
    %68 = arith.mulf %67, %19 : vector<4x256xf32>
    %cst_17 = arith.constant 2.500000e-01 : f32
    %69 = vector.broadcast %cst_17 : f32 to vector<4x256xf32>
    %70 = arith.mulf %69, %62 : vector<4x256xf32>
    %71 = arith.addf %68, %70 : vector<4x256xf32>
    %cst_18 = arith.constant 7.500000e-01 : f32
    %72 = vector.broadcast %cst_18 : f32 to vector<4x256xf32>
    %73 = arith.mulf %72, %19 : vector<4x256xf32>
    %cst_19 = arith.constant 2.500000e-01 : f32
    %74 = vector.broadcast %cst_19 : f32 to vector<4x256xf32>
    %75 = arith.mulf %74, %66 : vector<4x256xf32>
    %76 = arith.addf %73, %75 : vector<4x256xf32>
    %77 = tpu.concatenate %53, %58, %71, %76 in 0 : vector<4x256xf32>, vector<4x256xf32>, vector<4x256xf32>, vector<4x256xf32> -> vector<16x256xf32>
    %c0_20 = arith.constant 0 : index
    %c0_21 = arith.constant 0 : index
    %c0_22 = arith.constant 0 : index
    %78 = vector.load %arg3[%c0_20, %c0_21, %c0_22] : memref<1x16x256xf32, #tpu.memory_space<vmem>>, vector<1x16x256xf32>
    %79 = vector.shape_cast %78 : vector<1x16x256xf32> to vector<16x256xf32>
    %80 = vector.shape_cast %77 : vector<16x256xf32> to vector<1x16x256xf32>
    tpu.vector_store %arg3[%c0_20, %c0_21, %c0_22], %80 {strides = array<i32>} : memref<1x16x256xf32, #tpu.memory_space<vmem>>, vector<1x16x256xf32>,
    return
  }
  func.func @transform_0(%arg0: i32) -> (i32, i32) {
    %c0_i32 = arith.constant 0 : i32
    %c0_i32_0 = arith.constant 0 : i32
    %c0_i32_1 = arith.constant 0 : i32
    return %c0_i32, %c0_i32_0 : i32, i32
  }
  func.func @transform_1(%arg0: i32) -> (i32, i32, i32) {
    %c0_i32 = arith.constant 0 : i32
    %c0_i32_0 = arith.constant 0 : i32
    %c0_i32_1 = arith.constant 0 : i32
    return %arg0, %c0_i32, %c0_i32_0 : i32, i32, i32
  }
  func.func @transform_2(%arg0: i32) -> (i32, i32, i32) {
    %c0_i32 = arith.constant 0 : i32
    %c0_i32_0 = arith.constant 0 : i32
    %c0_i32_1 = arith.constant 0 : i32
    return %arg0, %c0_i32, %c0_i32_0 : i32, i32, i32
  }
}

</mosaic_0001>

<bundles_post_ra>
// kernel: scale_up_sample.1
= control target key start
LH: loop header
LB: loop body
LE: loop exit
PB: predicated region body
PF: predicated region fallthrough
CT: control target
= control target key end

     0   :  { %s457_s9 = smov 0   ;;  %s541_s0 = inlined_call_operand.vmem [shape: f32[4,4], index: 0, kind: input, shape index: {}]   ;;  %s542_s1 = inlined_call_operand.vmem [shape: f32[2,4,256], index: 1, kind: input, shape index: {}]   ;;  %s543_s2 = inlined_call_operand.vmem [shape: f32[2,16,256], index: 2, kind: output, shape index: {}]  }
   0x1 LB: > { %s401_s10 = sadd.s32 4294967295, %s436_s9   ;;  %p405_p0 = scmp.ge.s32.totalorder %s436_s9, 1  ;;  %s436_s9 = sphi %s457_s9, %s12_s9  }
   0x2   : > { %p112_p1 = scmp.lt.s32.totalorder %s436_s9, 3 }
   0x4   : > { %p113_p2 = pnand %p405_p0, %p112_p1 }
   0x5   : > { %p134_p3 = scmp.lt.s32.totalorder (!%p113_p2), %s401_s10, 1  ;;  %s438_s17 = smov (!%p113_p2), 112  }
   0x6   : > { %116 = sbr.rel (%p113_p2) target bundleno = 411 (0x19b), region = 28  ;;  %s439_s18 = smov (!%p113_p2), 16  }
   0x7   : > { %s440_s19 = smov (!%p113_p2), 127   ;;  %s441_s20 = smov (!%p113_p2), 1  }
   0xb   : > { %s549_s10 = smov (!%p134_p3, %s401_s10), 1  ;;  %vm154_vm0 = vcmask 1043456   ;;  %v145_v1 = vld [vmem:[%s541_s0] sm:$0xf]  ;;  %vm150_vm1 = vcmask 31744   ;;  %vm205_vm2 = vcmask 130048   ;;  %v229_v24 = vlaneseq }
   0xc   : > { %s416_s11 = sshll.u32 %s549_s10, 3  ;;  %vm214_vm3 = vcmask 916480   ;;  %vm277_vm4 = vcmask 1039360   ;;  %vm266_vm6 = vcmask 7168   ;;  %s417_s21 = sshll.u32 %s549_s10, 5 }
   0xd   : > { %s138_s14 = scalar_lea.vmem %s542_s1, %s416_s11  ;;  %v230_v26 = vand.u32 127, %v229_v24  ;;  %s506_s24 = scalar_lea.vmem %s543_s2, %s417_s21 }
   0xe   : > { %v144_v0 = vld [vmem:[%s138_s14] sm:$0xff] }
   0xf   : > { %147 = vst [vmem:[#allocation1] ss:$2 sm:$0xff] %v144_v0  ;;  %v236_v27 = vand.u32 15, %v230_v26  ;;  %v231_v40 = vadd.s32 128, %v230_v26 }
  0x11   : > { %vm488_vm5 = vcmp.eq.s32.totalorder %v236_v27, 15  ;;  %vm495_vm7 = vcmp.eq.s32.totalorder %v236_v27, 0  ;;  %v243_v44 = vand.u32 15, %v231_v40 }
  0x13   : > { %vm259_vm8 = vcmp.eq.s32.totalorder %v243_v44, 15  ;;  %vm257_vm9 = vcmp.eq.s32.totalorder %v243_v44, 0 }
  0x16   : > { %v148_v2 = vld.sshfl [vmem:[#allocation1] sm:$0xff pattern:$0x75316420]  ;;  %v149_v3 = vld.sshfl [vmem:[#allocation1 + $0x8] sm:$0xff pattern:$0x75316420] }
  0x17   : > { %410 = vmatpush.msk.msra.mxu0 %vm154_vm0, %v148_v2  ;;  %412 = vmatpush.msk.msra.mxu1 %vm154_vm0, %v149_v3 }
  0x18   : > { %411 = vmatmul.msk.f32.vlgmr.msra.gmra.mxu0 %vm150_vm1, %v145_v1  ;;  %413 = vmatmul.msk.f32.vlgmr.msra.gmra.mxu1 %vm150_vm1, %v145_v1 }
  0x95   : > { %v176_v4 = vpop.f32.mrf.mxu0  ;;  %v196_v5 = vpop.f32.mrf.mxu1 }
  0x96   : > { %210 = vrot.lane.b32.xlu1 %v176_v4, %s438_s17  ;;  %201 = vrot.lane.b32.xlu0 %v176_v4, %s439_s18  ;;  %v219_v9 = vmul.f32 0.75, %v176_v4  ;;  %v220_v17 = vmul.f32 0.75, %v196_v5 }
  0x9e   : > { %212 = vrot.lane.b32.xlu1 %v196_v5, %s438_s17  ;;  %203 = vrot.lane.b32.xlu0 %v196_v5, %s439_s18 }
 0x108   : > { %v211_v6 = vpop.permute.xlu1 %210  ;;  %v202_v7 = vpop.permute.xlu0 %201 }
 0x109   : > { %v209_v8 = vsel %vm205_vm2, %v176_v4, %v202_v7 }
 0x10a   : > { %v221_v10 = vmul.f32 0.25, %v209_v8 }
 0x10c   : > { %v223_v11 = vadd.f32 %v221_v10, %v219_v9 }
 0x10e   : > { %273 = vrot.lane.b32.xlu2 %v223_v11, %s440_s19  ;;  %v284_v33 = vmul.f32 0.75, %v223_v11 }
 0x110   : > { %v213_v12 = vpop.permute.xlu1 %212  ;;  %v204_v13 = vpop.permute.xlu0 %203 }
 0x111   : > { %v215_v14 = vsel %vm214_vm3, %v211_v6, %v213_v12  ;;  %v218_v15 = vsel %vm214_vm3, %v213_v12, %v196_v5  ;;  %v206_v16 = vsel %vm205_vm2, %v202_v7, %v204_v13 }
 0x112   : > { %v225_v18 = vmul.f32 0.25, %v215_v14  ;;  %v226_v19 = vmul.f32 0.25, %v218_v15  ;;  %v222_v20 = vmul.f32 0.25, %v206_v16 }
 0x114   : > { %v476_v21 = vadd.f32 %v225_v18, %v219_v9  ;;  %v478_v22 = vadd.f32 %v226_v19, %v220_v17  ;;  %v480_v23 = vadd.f32 %v222_v20, %v220_v17 }
 0x116   : > { %308 = vrot.lane.b32.xlu1 %v478_v22, %s440_s19  ;;  %306 = vrot.lane.b32.xlu0 %v476_v21, %s440_s19  ;;  %v285_v56 = vmul.f32 0.75, %v480_v23  ;;  %v317_v57 = vmul.f32 0.75, %v478_v22  ;;  %v316_v59 = vmul.f32 0.75, %v476_v21 }
 0x117   : > { %275 = vrot.lane.b32.xlu2 %v480_v23, %s440_s19 }
 0x11e   : > { %296 = vrot.lane.b32.xlu1 %v476_v21, %s441_s20  ;;  %264 = vrot.lane.b32.xlu0 %v480_v23, %s441_s20 }
 0x11f   : > { %262 = vrot.lane.b32.xlu2 %v223_v11, %s441_s20 }
 0x127   : > { %298 = vrot.lane.b32.xlu2 %v478_v22, %s441_s20 }
 0x168   : > { %v274_v25 = vpop.permute.xlu2 %273 }
 0x171   : > { %v276_v29 = vpop.permute.xlu2 %275 }
 0x172   : > { %v278_v30 = vsel %vm277_vm4, %v274_v25, %v276_v29  ;;  %v281_v45 = vsel %vm277_vm4, %v276_v29, %v480_v23 }
 0x173   : > { %v282_v31 = vsel %vm488_vm5, %v223_v11, %v278_v30  ;;  %v283_v48 = vsel %vm259_vm8, %v480_v23, %v281_v45 }
 0x174   : > { %v290_v32 = vmul.f32 0.25, %v282_v31  ;;  %v291_v53 = vmul.f32 0.25, %v283_v48 }
 0x176   : > { %v292_v36 = vadd.f32 %v290_v32, %v284_v33  ;;  %v293_v60 = vadd.f32 %v291_v53, %v285_v56 }
 0x178   : > { %v328_v41 = vrot.slane %v292_v36, 4  ;;  %v329_v10 = vrot.slane %v293_v60, 4 }
 0x179   : > { %v263_v35 = vpop.permute.xlu2 %262 }
 0x17a   : > { %v270_v37 = vsel %vm266_vm6, %v223_v11, %v263_v35 }
 0x17b   : > { %v271_v38 = vsel %vm495_vm7, %v223_v11, %v270_v37 }
 0x17c   : > { %v286_v39 = vmul.f32 0.25, %v271_v38 }
 0x17e   : > { %v288_v42 = vadd.f32 %v286_v39, %v284_v33 }
 0x180   : > { %v338_v43 = vsel %vm154_vm0, %v288_v42, %v328_v41 }
 0x181   : > { %342 = vst [vmem:[%s506_s24] sm:$0xff] %v338_v43  ;;  %v299_v58 = vpop.permute.xlu2 %298 }
 0x188   : > { %v309_v46 = vpop.permute.xlu1 %308  ;;  %v307_v47 = vpop.permute.xlu0 %306 }
 0x189   : > { %v313_v49 = vsel %vm277_vm4, %v309_v46, %v478_v22  ;;  %v310_v50 = vsel %vm277_vm4, %v307_v47, %v309_v46 }
 0x18a   : > { %v315_v51 = vsel %vm259_vm8, %v478_v22, %v313_v49  ;;  %v314_v52 = vsel %vm488_vm5, %v476_v21, %v310_v50 }
 0x18b   : > { %v323_v54 = vmul.f32 0.25, %v315_v51  ;;  %v322_v55 = vmul.f32 0.25, %v314_v52 }
 0x18d   : > { %v325_v61 = vadd.f32 %v323_v54, %v317_v57  ;;  %v324_v0 = vadd.f32 %v322_v55, %v316_v59 }
 0x18f   : > { %v335_v11 = vrot.slane %v325_v61, 4  ;;  %v334_v12 = vrot.slane %v324_v0, 4 }
 0x190   : > { %v297_v62 = vpop.permute.xlu1 %296  ;;  %v265_v63 = vpop.permute.xlu0 %264 }
 0x191   : > { %v300_v1 = vsel %vm266_vm6, %v297_v62, %v299_v58  ;;  %v303_v2 = vsel %vm266_vm6, %v476_v21, %v297_v62  ;;  %v267_v3 = vsel %vm266_vm6, %v263_v35, %v265_v63 }
 0x192   : > { %v304_v4 = vsel %vm495_vm7, %v476_v21, %v303_v2  ;;  %v305_v5 = vsel %vm257_vm9, %v478_v22, %v300_v1  ;;  %v272_v6 = vsel %vm257_vm9, %v480_v23, %v267_v3 }
 0x193   : > { %v318_v7 = vmul.f32 0.25, %v304_v4  ;;  %v319_v8 = vmul.f32 0.25, %v305_v5  ;;  %v287_v9 = vmul.f32 0.25, %v272_v6 }
 0x195   : > { %v320_v13 = vadd.f32 %v318_v7, %v316_v59  ;;  %v321_v14 = vadd.f32 %v319_v8, %v317_v57  ;;  %v289_v15 = vadd.f32 %v287_v9, %v285_v56 }
 0x197   : > { %v340_v16 = vsel %vm154_vm0, %v320_v13, %v334_v12  ;;  %v341_v17 = vsel %vm154_vm0, %v321_v14, %v335_v11  ;;  %v339_v18 = vsel %vm154_vm0, %v289_v15, %v329_v10 }
 0x198   : > { %344 = vst [vmem:[%s506_s24 + $0x10] sm:$0xff] %v340_v16 }
 0x199   : > { %345 = vst [vmem:[%s506_s24 + $0x18] sm:$0xff] %v341_v17 }
 0x19a   : > { %343 = vst [vmem:[%s506_s24 + $0x8] sm:$0xff] %v339_v18 }
 0x19b PF: > { %s12_s9 = sadd.s32 1, %s436_s9  }
 0x19c   : > { %p9_p4 = scmp.ge.s32.totalorder %s12_s9, 4  }
 0x19e   :  { %11 = sbr.rel (!%p9_p4) target bundleno = 1 (0x1), region = 58 }

</bundles_post_ra>
